<compile_context>
chip_gen: v7x
topology: tpu7x:2x2x1
jax: 0.10.0
libtpu: 0.0.40
codegen_flags: <defaults>
</compile_context>

<pallas_src>
import functools
import math

import jax
import jax.numpy as jnp
from jax.experimental import pallas as pl
from jax.experimental.pallas import tpu as pltpu


def _round_up(x, m):
    return ((x + m - 1) // m) * m


def _make_fused_gcn_kernel(n_layers, E, H):
    """Kernel closure. refs = (x, adj, w_0..w_{L-1}, b_0..b_{L-1}, out[, inter])."""

    def kernel(*refs):
        x_ref, adj_ref = refs[0], refs[1]
        w_refs = refs[2:2 + n_layers]
        b_refs = refs[2 + n_layers:2 + 2 * n_layers]
        o_ref = refs[2 + 2 * n_layers]
        inter_ref = refs[2 + 2 * n_layers + 1] if n_layers > 1 else None

        adj = adj_ref[...].astype(jnp.float32)           # (Bt, E*E), exact 0/1
        cur = x_ref[...]                                 # (Bt, E*Din) bf16

        for l in range(n_layers):
            w = w_refs[l][...]                           # (E*Din, E*H) bf16 block-diag
            b = b_refs[l][...]                           # (1, H) f32
            # One tall MXU matmul per layer: per-node X @ W for all Bt*E nodes.
            support = jnp.dot(cur, w, preferred_element_type=jnp.float32)  # (Bt, E*H)

            if l == n_layers - 1:
                # Final layer: only the center row (node 0) is consumed downstream.
                acc = adj[:, 0:1] * support[:, 0:H]
                for j in range(1, E):
                    acc = acc + adj[:, j:j + 1] * support[:, j * H:(j + 1) * H]
                o_ref[...] = acc + b
            else:
                # Intermediate layer: full E-node output, kept in VMEM scratch (VPU MAC).
                for i in range(E):
                    acc = adj[:, i * E:i * E + 1] * support[:, 0:H]
                    for j in range(1, E):
                        acc = (acc
                               + adj[:, i * E + j:i * E + j + 1]
                               * support[:, j * H:(j + 1) * H])
                    inter_ref[:, i * H:(i + 1) * H] = acc + b
                cur = inter_ref[...].astype(jnp.bfloat16)

    return kernel


@functools.partial(jax.jit, static_argnames=("block_b",))
def gcn_center_fused(x, adj, w_blocks, b_rows, *, block_b=1024):
    """Fused multi-layer GCN returning only the center-node features.

    x:        [B, E, D] float32 node features
    adj:      [B, E, E] float32 adjacency (0/1)
    w_blocks: tuple of [E*Din_l, E*H] bf16 block-diagonal weights (kron(I_E, W_l))
    b_rows:   tuple of [1, H] float32 biases
    returns:  [B, H] float32 center-node output of the last layer
    """
    B, E, D = x.shape
    H = b_rows[0].shape[-1]
    n_layers = len(w_blocks)

    # Lane-dense 2-D layout: one graph per row.
    x_flat = x.reshape(B, E * D).astype(jnp.bfloat16)
    adj_flat = adj.reshape(B, E * E).astype(jnp.bfloat16)   # 0/1 is exact in bf16

    # Batch tile: many graphs per grid step amortizes per-step overhead; even the
    # largest tile here is ~1 MB of VMEM (well under v7x's 32 MiB scoped default).
    bt = min(block_b, _round_up(B, 16))
    Bp = _round_up(B, bt)
    if Bp != B:
        x_flat = jnp.pad(x_flat, ((0, Bp - B), (0, 0)))
        adj_flat = jnp.pad(adj_flat, ((0, Bp - B), (0, 0)))

    in_specs = [
        pl.BlockSpec((bt, E * D), lambda i: (i, 0)),
        pl.BlockSpec((bt, E * E), lambda i: (i, 0)),
    ]
    for w in w_blocks:                      # weights/biases stay resident in VMEM
        in_specs.append(pl.BlockSpec(w.shape, lambda i: (0, 0)))
    for b in b_rows:
        in_specs.append(pl.BlockSpec(b.shape, lambda i: (0, 0)))

    scratch_shapes = []
    if n_layers > 1:
        scratch_shapes.append(pltpu.VMEM((bt, E * H), jnp.float32))

    out = pl.pallas_call(
        _make_fused_gcn_kernel(n_layers, E, H),
        out_shape=jax.ShapeDtypeStruct((Bp, H), jnp.float32),
        grid=(Bp // bt,),
        in_specs=in_specs,
        out_specs=pl.BlockSpec((bt, H), lambda i: (i, 0)),
        scratch_shapes=scratch_shapes,
        compiler_params=pltpu.CompilerParams(
            dimension_semantics=("parallel",)),  # shards batch axis over v7x's 2 TCs
    )(x_flat, adj_flat, *w_blocks, *b_rows)
    return out[:B]


class GraphEncoderPallas:
    """JAX/Pallas port of GraphEncoder: embedding lookup + fused stacked GCN layers."""

    def __init__(self, key, entity, emb_size, max_node, n_users=6040,
                 hiddim=100, layers=1, block_b=1024):
        self.max_node = max_node
        self.hiddim = hiddim
        self.block_b = block_b

        keys = jax.random.split(key, 2 + 2 * layers)
        # stand-in for pretrained entity embeddings
        entity_emb = 0.1 * jax.random.normal(keys[0], (entity, emb_size), jnp.float32)
        # user embeddings: xavier_uniform with relu gain (sqrt(2)), as in the module
        gain = math.sqrt(2.0)
        bound = gain * math.sqrt(6.0 / (n_users + emb_size))
        user_emb = jax.random.uniform(keys[1], (n_users, emb_size), jnp.float32,
                                      -bound, bound)
        self.embedding = jnp.concatenate([entity_emb, user_emb], axis=0)

        # GraphConvolution params: U(-stdv, stdv), stdv = 1/sqrt(out_features)
        self.weights, self.biases = [], []
        w_blocks, b_rows = [], []
        eye_e = jnp.eye(max_node, dtype=jnp.float32)
        indim = emb_size
        for l in range(layers):
            stdv = 1.0 / math.sqrt(hiddim)
            w = jax.random.uniform(keys[2 + 2 * l], (indim, hiddim), jnp.float32,
                                   -stdv, stdv)
            b = jax.random.uniform(keys[3 + 2 * l], (hiddim,), jnp.float32,
                                   -stdv, stdv)
            self.weights.append(w)
            self.biases.append(b)
            # block-diagonal packing -> the per-node matmul is ONE tall MXU op
            w_blocks.append(jnp.kron(eye_e, w).astype(jnp.bfloat16))
            b_rows.append(b.reshape(1, hiddim))
            indim = hiddim
        self.w_blocks = tuple(w_blocks)
        self.b_rows = tuple(b_rows)

    def __call__(self, neighbor_ids, adjs):
        """
        neighbor_ids: [N, L, E] int32 node ids
        adjs:         [N, L, E, E] float32 adjacency
        returns:      [N, L, H] center-node embedding per step
                      (== output_state[:, :, 0, :] of the PyTorch module, N, L > 1)
        """
        N, L, E = neighbor_ids.shape
        B = N * L
        D = self.embedding.shape[1]
        # embedding gather (glue, plain JAX)
        # TODO(synk): could be fused into the kernel (PrefetchScalarGridSpec +
        # row-gather BlockSpec) to avoid materializing x in HBM.
        x = jnp.take(self.embedding, neighbor_ids.reshape(-1), axis=0)
        x = x.reshape(B, E, D)
        adj = adjs.reshape(B, E, E)
        center = gcn_center_fused(x, adj, self.w_blocks, self.b_rows,
                                  block_b=self.block_b)
        return center.reshape(N, L, self.hiddim)


def build_synthetic_graph(key, N, L, E, vocab):
    """Deterministic stand-in for GraphConstructer: star graphs with self loops.
    (The original reads kg.txt / a pickle cache on the host; no kernel equivalent.)"""
    k1, k2 = jax.random.split(key)
    ids = jax.random.randint(k1, (N, L, E), 0, vocab, dtype=jnp.int32)
    counts = jax.random.randint(k2, (N, L), 1, E + 1, dtype=jnp.int32)
    idx = jnp.arange(E)
    valid = idx[None, None, :] < counts[:, :, None]              # [N, L, E]
    ids = jnp.where(valid, ids, 0)
    star = ((idx[:, None] == 0) | (idx[None, :] == 0)
            | (idx[:, None] == idx[None, :]))                    # [E, E]
    adj = (valid[..., :, None] & valid[..., None, :]
           & star[None, None, :, :]).astype(jnp.float32)         # [N, L, E, E]
    return ids, adj


def _round_bf16(v):
    return v.astype(jnp.bfloat16).astype(jnp.float32)


def reference_forward(encoder, neighbor_ids, adjs):
    """Pure-JAX reference with the same bf16 input rounding as the kernel.
    (Fixes the previous bug: the old einsum 'nlee,nlef->nlef' took the adjacency
    diagonal instead of doing the batched matmul adj @ (X W).)"""
    N, L, E = neighbor_ids.shape
    D = encoder.embedding.shape[1]
    x = jnp.take(encoder.embedding, neighbor_ids.reshape(-1), axis=0)
    cur = _round_bf16(x.reshape(N, L, E, D))
    n_layers = len(encoder.weights)
    for li, (w, b) in enumerate(zip(encoder.weights, encoder.biases)):
        wr = _round_bf16(w)
        # per-node X @ W, explicit f32 broadcast-sum (avoids TPU matmul precision modes)
        support = (cur[..., :, :, None] * wr[None, None, None, :, :]).sum(axis=-2)
        # batched adj @ support: out[n,l,i,:] = sum_j adj[n,l,i,j] * support[n,l,j,:]
        out = (adjs[..., :, :, None] * support[..., None, :, :]).sum(axis=-2) + b
        if li < n_layers - 1:
            cur = _round_bf16(out)   # kernel casts intermediates to bf16 for the MXU
        else:
            cur = out
    return cur[:, :, 0, :]


if __name__ == "__main__":
    # Small, forward-consistent shapes
    N = 2          # batch
    L = 4          # max_seq_length
    E = 8          # max_nodes
    EMB = 16       # emb_size
    HID = 32       # hiddim
    ENTITY = 50
    N_USERS = 10   # stands in for the 6040 users

    root = jax.random.PRNGKey(0)
    k1, k2, k_data = jax.random.split(root, 3)

    neighbor_ids, adjs = build_synthetic_graph(k_data, N, L, E, ENTITY + N_USERS)

    # 1-layer encoder (module default): exercises the center-only final-layer path.
    enc1 = GraphEncoderPallas(k1, ENTITY, EMB, E, n_users=N_USERS,
                              hiddim=HID, layers=1)
    out1 = enc1(neighbor_ids, adjs)
    jax.block_until_ready(out1)
    assert out1.shape == (N, L, HID)
    ref1 = reference_forward(enc1, neighbor_ids, adjs)
    assert jnp.allclose(out1, ref1, atol=2e-4, rtol=2e-4), \
        "1-layer mismatch vs JAX reference"

    # 2-layer encoder: exercises the fused intermediate-layer (VMEM scratch) path.
    enc2 = GraphEncoderPallas(k2, ENTITY, EMB, E, n_users=N_USERS,
                              hiddim=HID, layers=2)
    out2 = enc2(neighbor_ids, adjs)
    jax.block_until_ready(out2)
    assert out2.shape == (N, L, HID)
    ref2 = reference_forward(enc2, neighbor_ids, adjs)
    # looser tolerance: intermediate bf16 rounding can flip a ulp vs the reference
    assert jnp.allclose(out2, ref2, atol=1e-2, rtol=1e-2), \
        "2-layer mismatch vs JAX reference"

    print("KERNEL_OK")
</pallas_src>

<mosaic_0001>
module attributes {stable_mosaic.version = 11 : i64} {
  func.func @kernel(%arg0: i32, %arg1: memref<16x128xbf16, #tpu.memory_space<vmem>>, %arg2: memref<16x64xbf16, #tpu.memory_space<vmem>>, %arg3: memref<128x256xbf16, #tpu.memory_space<vmem>>, %arg4: memref<1x32xf32, #tpu.memory_space<vmem>>, %arg5: memref<16x32xf32, #tpu.memory_space<vmem>>) attributes {dimension_semantics = [#tpu.dimension_semantics<parallel>], iteration_bounds = array<i64: 1>, scalar_prefetch = 0 : i64, scratch_operands = 0 : i64, tpu.core_type = #tpu.core_type<tc>, window_params = [{transform_indices = @transform_0, window_bounds = array<i64: 16, 128>}, {transform_indices = @transform_1, window_bounds = array<i64: 16, 64>}, {pipeline_mode = #tpu.pipeline_mode<synchronous>, transform_indices = @transform_2, window_bounds = array<i64: 128, 256>}, {pipeline_mode = #tpu.pipeline_mode<synchronous>, transform_indices = @transform_3, window_bounds = array<i64: 1, 32>}, {transform_indices = @transform_4, window_bounds = array<i64: 16, 32>}]} {
    %c0 = arith.constant 0 : index
    %c0_0 = arith.constant 0 : index
    %0 = vector.load %arg2[%c0, %c0_0] : memref<16x64xbf16, #tpu.memory_space<vmem>>, vector<16x64xbf16>
    %1 = arith.extf %0 : vector<16x64xbf16> to vector<16x64xf32>
    %c0_1 = arith.constant 0 : index
    %c0_2 = arith.constant 0 : index
    %2 = vector.load %arg1[%c0_1, %c0_2] : memref<16x128xbf16, #tpu.memory_space<vmem>>, vector<16x128xbf16>
    %c0_3 = arith.constant 0 : index
    %c0_4 = arith.constant 0 : index
    %3 = vector.load %arg3[%c0_3, %c0_4] : memref<128x256xbf16, #tpu.memory_space<vmem>>, vector<128x256xbf16>
    %c0_5 = arith.constant 0 : index
    %c0_6 = arith.constant 0 : index
    %4 = vector.load %arg4[%c0_5, %c0_6] : memref<1x32xf32, #tpu.memory_space<vmem>>, vector<1x32xf32>
    %cst = arith.constant dense<0.000000e+00> : vector<16x256xf32>
    %5 = tpu.matmul %2, %3, %cst {dimension_numbers = #tpu.dot_dimension_numbers<[1], [0], [0], [1], [0, 0, 1, 1], [], []>} : vector<16x128xbf16>, vector<128x256xbf16>, vector<16x256xf32> -> vector<16x256xf32>
    %6 = vector.extract_strided_slice %1 {offsets = [0, 0], sizes = [16, 1], strides = [1, 1]} : vector<16x64xf32> to vector<16x1xf32>
    %7 = vector.extract_strided_slice %5 {offsets = [0, 0], sizes = [16, 32], strides = [1, 1]} : vector<16x256xf32> to vector<16x32xf32>
    %8 = vector.broadcast %6 : vector<16x1xf32> to vector<16x32xf32>
    %9 = arith.mulf %8, %7 : vector<16x32xf32>
    %10 = vector.extract_strided_slice %1 {offsets = [0, 1], sizes = [16, 1], strides = [1, 1]} : vector<16x64xf32> to vector<16x1xf32>
    %11 = vector.extract_strided_slice %5 {offsets = [0, 32], sizes = [16, 32], strides = [1, 1]} : vector<16x256xf32> to vector<16x32xf32>
    %12 = vector.broadcast %10 : vector<16x1xf32> to vector<16x32xf32>
    %13 = arith.mulf %12, %11 : vector<16x32xf32>
    %14 = arith.addf %9, %13 : vector<16x32xf32>
    %15 = vector.extract_strided_slice %1 {offsets = [0, 2], sizes = [16, 1], strides = [1, 1]} : vector<16x64xf32> to vector<16x1xf32>
    %16 = vector.extract_strided_slice %5 {offsets = [0, 64], sizes = [16, 32], strides = [1, 1]} : vector<16x256xf32> to vector<16x32xf32>
    %17 = vector.broadcast %15 : vector<16x1xf32> to vector<16x32xf32>
    %18 = arith.mulf %17, %16 : vector<16x32xf32>
    %19 = arith.addf %14, %18 : vector<16x32xf32>
    %20 = vector.extract_strided_slice %1 {offsets = [0, 3], sizes = [16, 1], strides = [1, 1]} : vector<16x64xf32> to vector<16x1xf32>
    %21 = vector.extract_strided_slice %5 {offsets = [0, 96], sizes = [16, 32], strides = [1, 1]} : vector<16x256xf32> to vector<16x32xf32>
    %22 = vector.broadcast %20 : vector<16x1xf32> to vector<16x32xf32>
    %23 = arith.mulf %22, %21 : vector<16x32xf32>
    %24 = arith.addf %19, %23 : vector<16x32xf32>
    %25 = vector.extract_strided_slice %1 {offsets = [0, 4], sizes = [16, 1], strides = [1, 1]} : vector<16x64xf32> to vector<16x1xf32>
    %26 = vector.extract_strided_slice %5 {offsets = [0, 128], sizes = [16, 32], strides = [1, 1]} : vector<16x256xf32> to vector<16x32xf32>
    %27 = vector.broadcast %25 : vector<16x1xf32> to vector<16x32xf32>
    %28 = arith.mulf %27, %26 : vector<16x32xf32>
    %29 = arith.addf %24, %28 : vector<16x32xf32>
    %30 = vector.extract_strided_slice %1 {offsets = [0, 5], sizes = [16, 1], strides = [1, 1]} : vector<16x64xf32> to vector<16x1xf32>
    %31 = vector.extract_strided_slice %5 {offsets = [0, 160], sizes = [16, 32], strides = [1, 1]} : vector<16x256xf32> to vector<16x32xf32>
    %32 = vector.broadcast %30 : vector<16x1xf32> to vector<16x32xf32>
    %33 = arith.mulf %32, %31 : vector<16x32xf32>
    %34 = arith.addf %29, %33 : vector<16x32xf32>
    %35 = vector.extract_strided_slice %1 {offsets = [0, 6], sizes = [16, 1], strides = [1, 1]} : vector<16x64xf32> to vector<16x1xf32>
    %36 = vector.extract_strided_slice %5 {offsets = [0, 192], sizes = [16, 32], strides = [1, 1]} : vector<16x256xf32> to vector<16x32xf32>
    %37 = vector.broadcast %35 : vector<16x1xf32> to vector<16x32xf32>
    %38 = arith.mulf %37, %36 : vector<16x32xf32>
    %39 = arith.addf %34, %38 : vector<16x32xf32>
    %40 = vector.extract_strided_slice %1 {offsets = [0, 7], sizes = [16, 1], strides = [1, 1]} : vector<16x64xf32> to vector<16x1xf32>
    %41 = vector.extract_strided_slice %5 {offsets = [0, 224], sizes = [16, 32], strides = [1, 1]} : vector<16x256xf32> to vector<16x32xf32>
    %42 = vector.broadcast %40 : vector<16x1xf32> to vector<16x32xf32>
    %43 = arith.mulf %42, %41 : vector<16x32xf32>
    %44 = arith.addf %39, %43 : vector<16x32xf32>
    %45 = vector.broadcast %4 : vector<1x32xf32> to vector<16x32xf32>
    %46 = arith.addf %44, %45 : vector<16x32xf32>
    %c0_7 = arith.constant 0 : index
    %c0_8 = arith.constant 0 : index
    %47 = vector.load %arg5[%c0_7, %c0_8] : memref<16x32xf32, #tpu.memory_space<vmem>>, vector<16x32xf32>
    tpu.vector_store %arg5[%c0_7, %c0_8], %46 {strides = array<i32>} : memref<16x32xf32, #tpu.memory_space<vmem>>, vector<16x32xf32>,
    return
  }
  func.func @transform_0(%arg0: i32) -> (i32, i32) {
    %c0_i32 = arith.constant 0 : i32
    %c0_i32_0 = arith.constant 0 : i32
    return %arg0, %c0_i32 : i32, i32
  }
  func.func @transform_1(%arg0: i32) -> (i32, i32) {
    %c0_i32 = arith.constant 0 : i32
    %c0_i32_0 = arith.constant 0 : i32
    return %arg0, %c0_i32 : i32, i32
  }
  func.func @transform_2(%arg0: i32) -> (i32, i32) {
    %c0_i32 = arith.constant 0 : i32
    %c0_i32_0 = arith.constant 0 : i32
    %c0_i32_1 = arith.constant 0 : i32
    return %c0_i32, %c0_i32_0 : i32, i32
  }
  func.func @transform_3(%arg0: i32) -> (i32, i32) {
    %c0_i32 = arith.constant 0 : i32
    %c0_i32_0 = arith.constant 0 : i32
    %c0_i32_1 = arith.constant 0 : i32
    return %c0_i32, %c0_i32_0 : i32, i32
  }
  func.func @transform_4(%arg0: i32) -> (i32, i32) {
    %c0_i32 = arith.constant 0 : i32
    %c0_i32_0 = arith.constant 0 : i32
    return %arg0, %c0_i32 : i32, i32
  }
}

</mosaic_0001>

<bundles_post_ra>
// kernel: gcn_center_fused.1
= control target key start
LH: loop header
LB: loop body
LE: loop exit
PB: predicated region body
PF: predicated region fallthrough
CT: control target
= control target key end

     0   :  { %v435_v1 = vmov 0   ;;  %v436_v2 = vmov 3   ;;  %v437_v4 = vmov 1   ;;  %v438_v20 = vmov 5   ;;  %s445_s24 = smov 32   ;;  %s534_s2 = inlined_call_operand.vmem [shape: bf16[128,256], index: 2, kind: input, shape index: {}]   ;;  %s535_s1 = inlined_call_operand.vmem [shape: bf16[16,64], index: 1, kind: input, shape index: {}]   ;;  %s536_s0 = inlined_call_operand.vmem [shape: bf16[16,128], index: 0, kind: input, shape index: {}]   ;;  %s537_s3 = inlined_call_operand.vmem [shape: f32[1,32], index: 3, kind: input, shape index: {}]   ;;  %s538_s4 = inlined_call_operand.vmem [shape: f32[16,32], index: 4, kind: output, shape index: {}]  }
   0x1   :  { %v410_v0 = vld [vmem:[%s534_s2 + $0x4] ss:$8 sps:$4 sm:$0xff]   ;;  %159 = vmatprep.mubr.bf16.mxu0 %v435_v1  ;;  %374 = vset.pattern.permute.xlu1 %v436_v2  ;;  %v412_v3 = vld [vmem:[%s534_s2] ss:$8 sps:$4 sm:$0xff]   ;;  %v413_v5 = vld [vmem:[%s534_s2 + $0x14] ss:$8 sps:$4 sm:$0xff]  }
   0x2   :  { %362 = vset.pattern.permute.xlu0 %v437_v4  ;;  %127 = vmatprep.subr.bf16.mxu0 %v410_v0  ;;  %v415_v6 = vld [vmem:[%s534_s2 + $0x10] ss:$8 sps:$4 sm:$0xff]   ;;  %v416_v7 = vld [vmem:[%s534_s2 + $0x24] ss:$8 sps:$4 sm:$0xff]   ;;  %v418_v8 = vld [vmem:[%s534_s2 + $0x20] ss:$8 sps:$4 sm:$0xff]  }
   0x3   :  { %128 = vmatpush1.bf16.msra.mxu0 %v412_v3  ;;  %v419_v9 = vld [vmem:[%s534_s2 + $0x34] ss:$8 sps:$4 sm:$0xff]   ;;  %v421_v10 = vld [vmem:[%s534_s2 + $0x30] ss:$8 sps:$4 sm:$0xff]   ;;  %v348_v11 = vld [vmem:[%s535_s1] sm:$0xff]   ;;  %v439_v21 = vmov 2  }
   0x4   :  { %129 = vmatprep.subr.bf16.mxu0 %v413_v5  ;;  %v422_v12 = vld [vmem:[%s534_s2 + $0x44] ss:$8 sps:$4 sm:$0xff]   ;;  %v349_v13 = vunpack.c.l.bf16 %v348_v11  ;;  %v350_v14 = vunpack.c.h.bf16 %v348_v11  ;;  %v424_v16 = vld [vmem:[%s534_s2 + $0x40] ss:$8 sps:$4 sm:$0xff]   ;;  %v425_v17 = vld [vmem:[%s534_s2 + $0x54] ss:$8 sps:$4 sm:$0xff]  }
   0x5   :  { %v427_v18 = vld [vmem:[%s534_s2 + $0x50] ss:$8 sps:$4 sm:$0xff]   ;;  %v428_v19 = vld [vmem:[%s534_s2 + $0x64] ss:$8 sps:$4 sm:$0xff]   ;;  %v430_v22 = vld [vmem:[%s534_s2 + $0x60] ss:$8 sps:$4 sm:$0xff]  }
   0x6   :  { %v375_v15 = vpack.i.bf16 %v350_v14, %v349_v13  ;;  %v431_v23 = vld [vmem:[%s534_s2 + $0x74] ss:$8 sps:$4 sm:$0xff]   ;;  %v440_v24 = vmov 6   ;;  %v441_v25 = vmov 7   ;;  %v433_v26 = vld [vmem:[%s534_s2 + $0x70] ss:$8 sps:$4 sm:$0xff]  }
   0x7   :  { %130 = vmatpush1.bf16.msra.mxu0 %v415_v6  ;;  %v434_v27 = vld [vmem:[%s536_s0] sm:$0xff]   ;;  %v442_v28 = vmov 4   ;;  %s443_s2 = smov 96   ;;  %s444_s0 = smov 64   ;;  %vm322_vm0 = vcmask 261120  }
   0x8   :  { %131 = vmatprep.subr.bf16.mxu0 %v416_v7  ;;  %376 = vperm.xlu1 %374, %v375_v15  }
   0x9   :  { %364 = vperm.xlu0 %362, %v375_v15  }
   0xb   :  { %132 = vmatpush1.bf16.msra.mxu0 %v418_v8 }
   0xc   :  { %133 = vmatprep.subr.bf16.mxu0 %v419_v9  ;;  %380 = vset.pattern.permute.xlu1 %v438_v20 }
   0xd   :  { %382 = vperm.xlu1 %380, %v375_v15   ;;  %368 = vset.pattern.permute.xlu0 %v439_v21 }
   0xe   :  { %370 = vperm.xlu0 %368, %v375_v15  }
   0xf   :  { %134 = vmatpush1.bf16.msra.mxu0 %v421_v10 }
  0x10   :  { %135 = vmatprep.subr.bf16.mxu0 %v422_v12 }
  0x11   :  { %386 = vset.pattern.permute.xlu1 %v440_v24 }
  0x12   :  { %388 = vperm.xlu1 %386, %v375_v15   ;;  %392 = vset.pattern.permute.xlu0 %v441_v25 }
  0x13   :  { %136 = vmatpush1.bf16.msra.mxu0 %v424_v16  ;;  %394 = vperm.xlu0 %392, %v375_v15  }
  0x14   :  { %137 = vmatprep.subr.bf16.mxu0 %v425_v17 }
  0x16   :  { %398 = vset.pattern.permute.xlu1 %v435_v1 }
  0x17   :  { %138 = vmatpush1.bf16.msra.mxu0 %v427_v18  ;;  %400 = vperm.xlu1 %398, %v375_v15  }
  0x18   :  { %139 = vmatprep.subr.bf16.mxu0 %v428_v19 }
  0x1b   :  { %140 = vmatpush1.bf16.msra.mxu0 %v430_v22  ;;  %404 = vset.pattern.permute.xlu1 %v442_v28 }
  0x1c   :  { %141 = vmatprep.subr.bf16.mxu0 %v431_v23  ;;  %406 = vperm.xlu1 %404, %v375_v15  }
  0x1f   :  { %142 = vmatpush1.bf16.msra.mxu0 %v433_v26 }
  0x22   :  { %160 = vmatmul.mubr.bf16.vlgmr.msra.gmra.mrb[0].mxu0 %v434_v27 }
  0x87   :  { %v377_v31 = vpop.permute.xlu1 %376 }
  0x88   :  { %v365_v29 = vpop.permute.xlu0 %364  ;;  %v378_v42 = vunpack.i.l.bf16 %v377_v31  ;;  %v379_v45 = vunpack.i.h.bf16 %v377_v31 }
  0x89   :  { %v366_v30 = vunpack.i.l.bf16 %v365_v29  ;;  %v367_v32 = vunpack.i.h.bf16 %v365_v29 }
  0x8c   :  { %v383_v44 = vpop.permute.xlu1 %382 }
  0x8d   :  { %v371_v33 = vpop.permute.xlu0 %370  ;;  %v384_v47 = vunpack.i.l.bf16 %v383_v44  ;;  %v385_v49 = vunpack.i.h.bf16 %v383_v44 }
  0x8e   :  { %v372_v35 = vunpack.i.l.bf16 %v371_v33  ;;  %v373_v39 = vunpack.i.h.bf16 %v371_v33 }
  0x91   :  { %v389_v51 = vpop.permute.xlu1 %388 }
  0x92   :  { %v390_v52 = vunpack.i.l.bf16 %v389_v51  ;;  %v395_v54 = vpop.permute.xlu0 %394  ;;  %v391_v55 = vunpack.i.h.bf16 %v389_v51 }
  0x93   :  { %v396_v57 = vunpack.i.l.bf16 %v395_v54  ;;  %v397_v59 = vunpack.i.h.bf16 %v395_v54 }
  0x96   :  { %v401_v63 = vpop.permute.xlu1 %400 }
  0x97   :  { %v402_v1 = vunpack.i.l.bf16 %v401_v63  ;;  %v403_v3 = vunpack.i.h.bf16 %v401_v63 }
  0x9b   :  { %v407_v0 = vpop.permute.xlu1 %406 }
  0x9c   :  { %v408_v7 = vunpack.i.l.bf16 %v407_v0  ;;  %v409_v11 = vunpack.i.h.bf16 %v407_v0 }
  0xf5   :  { %v161_v34 = vpop.f32.mrb[0].mxu0 }
  0xf6   :  { %v163_v36 = vpop.f32.mrb[1].mxu0  ;;  %v190_v37 = vmul.f32 %v366_v30, %v161_v34  ;;  %v210_v43 = vmul.f32 %v372_v35, %v161_v34  ;;  %v230_v48 = vmul.f32 %v378_v42, %v161_v34  ;;  %v180_v5 = vmul.f32 %v402_v1, %v161_v34  ;;  %v346_v30 = vld [vmem:[%s537_s3] ss:$0 sm:$0xff] }
  0xf7   :  { %v165_v38 = vpop.f32.mrb[2].mxu0  ;;  %v262_v53 = vmul.f32 %v384_v47, %v163_v36  ;;  %v282_v58 = vmul.f32 %v390_v52, %v163_v36  ;;  %v302_v61 = vmul.f32 %v396_v57, %v163_v36  ;;  %v250_v17 = vmul.f32 %v408_v7, %v163_v36 }
  0xf8   :  { %194 = vrot.lane.b32.xlu0 %v190_v37, %s443_s2  ;;  %v167_v40 = vpop.f32.mrb[3].mxu0  ;;  %v191_v41 = vmul.f32 %v367_v32, %v165_v38  ;;  %v211_v46 = vmul.f32 %v373_v39, %v165_v38  ;;  %v231_v50 = vmul.f32 %v379_v45, %v165_v38  ;;  %v181_v9 = vmul.f32 %v403_v3, %v165_v38 }
  0xf9   :  { %v263_v56 = vmul.f32 %v385_v49, %v167_v40  ;;  %v283_v60 = vmul.f32 %v391_v55, %v167_v40  ;;  %v303_v62 = vmul.f32 %v397_v59, %v167_v40  ;;  %v251_v19 = vmul.f32 %v409_v11, %v167_v40 }
  0xfa   :  { %196 = vrot.lane.b32.xlu1 %v191_v41, %s443_s2 }
  0xfc   :  { %214 = vrot.lane.b32.xlu0 %v210_v43, %s444_s0 }
  0xfe   :  { %216 = vrot.lane.b32.xlu1 %v211_v46, %s444_s0 }
 0x100   :  { %234 = vrot.lane.b32.xlu0 %v230_v48, %s445_s24 }
 0x102   :  { %236 = vrot.lane.b32.xlu1 %v231_v50, %s445_s24 }
 0x104   :  { %266 = vrot.lane.b32.xlu0 %v262_v53, %s443_s2 }
 0x106   :  { %268 = vrot.lane.b32.xlu1 %v263_v56, %s443_s2 }
 0x108   :  { %286 = vrot.lane.b32.xlu0 %v282_v58, %s444_s0 }
 0x10a   :  { %288 = vrot.lane.b32.xlu1 %v283_v60, %s444_s0 }
 0x10c   :  { %306 = vrot.lane.b32.xlu0 %v302_v61, %s445_s24 }
 0x10e   :  { %308 = vrot.lane.b32.xlu1 %v303_v62, %s445_s24 }
 0x16a   :  { %v195_v2 = vpop.permute.xlu0 %194 }
 0x16b   :  { %v200_v8 = vadd.f32 %v195_v2, %v180_v5 }
 0x16c   :  { %v197_v4 = vpop.permute.xlu1 %196 }
 0x16d   :  { %v201_v12 = vadd.f32 %v197_v4, %v181_v9 }
 0x16e   :  { %v215_v6 = vpop.permute.xlu0 %214 }
 0x16f   :  { %v220_v13 = vadd.f32 %v215_v6, %v200_v8 }
 0x170   :  { %v217_v10 = vpop.permute.xlu1 %216 }
 0x171   :  { %v221_v15 = vadd.f32 %v217_v10, %v201_v12 }
 0x172   :  { %v235_v14 = vpop.permute.xlu0 %234 }
 0x173   :  { %v240_v16 = vadd.f32 %v235_v14, %v220_v13 }
 0x174   :  { %v237_v18 = vpop.permute.xlu1 %236 }
 0x175   :  { %v241_v20 = vadd.f32 %v237_v18, %v221_v15  ;;  %v252_v21 = vadd.f32 %v250_v17, %v240_v16 }
 0x176   :  { %v267_v22 = vpop.permute.xlu0 %266 }
 0x177   :  { %v253_v23 = vadd.f32 %v251_v19, %v241_v20  ;;  %v272_v26 = vadd.f32 %v267_v22, %v252_v21 }
 0x178   :  { %v269_v24 = vpop.permute.xlu1 %268 }
 0x179   :  { %v273_v28 = vadd.f32 %v269_v24, %v253_v23 }
 0x17a   :  { %v287_v25 = vpop.permute.xlu0 %286 }
 0x17b   :  { %v292_v29 = vadd.f32 %v287_v25, %v272_v26 }
 0x17c   :  { %v289_v27 = vpop.permute.xlu1 %288 }
 0x17d   :  { %v293_v32 = vadd.f32 %v289_v27, %v273_v28 }
 0x17e   :  { %v307_v31 = vpop.permute.xlu0 %306 }
 0x17f   :  { %v312_v33 = vadd.f32 %v307_v31, %v292_v29 }
 0x180   :  { %v309_v34 = vpop.permute.xlu1 %308 }
 0x181   :  { %v320_v35 = vadd.f32 %v346_v30, %v312_v33  ;;  %v313_v36 = vadd.f32 %v309_v34, %v293_v32 }
 0x183   :  { %323 = vst.msk [vmem:[%s538_s4] sm:$0xff] %vm322_vm0, %v320_v35  ;;  %v321_v37 = vadd.f32 %v346_v30, %v313_v36 }
 0x185   :  { %324 = vst.msk [vmem:[%s538_s4 + $0x8] sm:$0xff] %vm322_vm0, %v321_v37 }

</bundles_post_ra>
